<compile_context>
chip_gen: v7x
topology: tpu7x:2x2x1
jax: 0.10.0
libtpu: 0.0.40
codegen_flags: <defaults>
</compile_context>

<pallas_src>
import functools

import numpy as np
import jax
import jax.numpy as jnp
from jax.experimental import pallas as pl
from jax.experimental.pallas import tpu as pltpu

# Sobel taps (the module's fixed, non-trainable "parameters") -- used only by
# the pure-JAX reference; the kernel uses the separable form directly.
_KX = ((-1.0, 0.0, 1.0),
       (-2.0, 0.0, 2.0),
       (-1.0, 0.0, 1.0))
_KY = (( 1.0,  2.0,  1.0),
       ( 0.0,  0.0,  0.0),
       (-1.0, -2.0, -1.0))


# ----------------------------------------------------------------------------
# Kernels
# ----------------------------------------------------------------------------
def _sobel_flat_kernel(m_ref, x_ref, o_ref, *, W, HW, compute_dtype):
    """Flattened layout.  x_ref/o_ref: (TB, H*W); m_ref: (4, H*W) 0/1 masks.

    Flattened index f = i*W + j.  Row neighbours are lane rolls by +-W,
    column neighbours lane rolls by +-1; plane borders are zeroed by the
    resident masks (== conv2d zero padding).
    """
    x = x_ref[...].astype(compute_dtype)

    m_top = m_ref[0:1, :]      # row i-1 exists
    m_bot = m_ref[1:2, :]      # row i+1 exists
    m_left = m_ref[2:3, :]     # col j-1 exists
    m_right = m_ref[3:4, :]    # col j+1 exists

    up = pltpu.roll(x, W, axis=1) * m_top            # x[i-1, j]
    down = pltpu.roll(x, HW - W, axis=1) * m_bot     # x[i+1, j]

    # Separable vertical pass.
    a = up + 2.0 * x + down    # (1, 2, 1)  -> feeds gx
    b = up - down              # (1, 0, -1) -> feeds gy

    a_p = pltpu.roll(a, HW - 1, axis=1) * m_right    # a[i, j+1]
    a_m = pltpu.roll(a, 1, axis=1) * m_left          # a[i, j-1]
    b_p = pltpu.roll(b, HW - 1, axis=1) * m_right    # b[i, j+1]
    b_m = pltpu.roll(b, 1, axis=1) * m_left          # b[i, j-1]

    gx = a_p - a_m
    gy = b_m + 2.0 * b + b_p
    o_ref[...] = (jnp.abs(gx) + jnp.abs(gy)).astype(o_ref.dtype)


def _sobel_3d_kernel(rm_ref, cm_ref, x_ref, o_ref, *, H, W, compute_dtype):
    """3-D layout.  x_ref/o_ref: (TB, H, W); rm_ref: (2, H, 1); cm_ref: (2, 1, W).

    Row neighbours are +-1 sublane rolls (axis=1), column neighbours +-1 lane
    rolls (axis=2); compact masks broadcast along the missing axis.
    """
    x = x_ref[...].astype(compute_dtype)

    not_top = rm_ref[0:1]      # (1, H, 1): row i-1 exists
    not_bot = rm_ref[1:2]      # (1, H, 1): row i+1 exists
    not_left = cm_ref[0:1]     # (1, 1, W): col j-1 exists
    not_right = cm_ref[1:2]    # (1, 1, W): col j+1 exists

    up = pltpu.roll(x, 1, axis=1) * not_top          # x[i-1, j]
    down = pltpu.roll(x, H - 1, axis=1) * not_bot    # x[i+1, j]

    a = up + 2.0 * x + down
    b = up - down

    a_p = pltpu.roll(a, W - 1, axis=2) * not_right   # a[i, j+1]
    a_m = pltpu.roll(a, 1, axis=2) * not_left        # a[i, j-1]
    b_p = pltpu.roll(b, W - 1, axis=2) * not_right   # b[i, j+1]
    b_m = pltpu.roll(b, 1, axis=2) * not_left        # b[i, j-1]

    gx = a_p - a_m
    gy = b_m + 2.0 * b + b_p
    o_ref[...] = (jnp.abs(gx) + jnp.abs(gy)).astype(o_ref.dtype)


# ----------------------------------------------------------------------------
# Chip / sizing heuristics
# ----------------------------------------------------------------------------
def _num_tensorcores():
    """Best-effort TensorCore count per device (clamped to [1, 2])."""
    try:
        d = jax.devices()[0]
        nc = getattr(d, "num_cores", None)
        if nc:
            return max(1, min(2, int(nc)))
        kind = str(getattr(d, "device_kind", "")).lower()
        if "v7" in kind or "v4" in kind:
            return 2
    except Exception:
        pass
    return 1


def _vmem_capacity_bytes():
    try:
        return int(pltpu.get_tpu_info().vmem_capacity_bytes)
    except Exception:
        return 64 << 20   # conservative (v7x per-core physical VMEM)


def _compute_dtype(in_dtype):
    """bf16 math on chips with a bf16 VPU; f32 otherwise."""
    if in_dtype == jnp.bfloat16:
        try:
            kind = str(jax.devices()[0].device_kind).lower()
        except Exception:
            kind = ""
        if "v5 lite" in kind or "v5lite" in kind or "v5e" in kind:
            return jnp.float32   # v5e VPU has no bf16 ALU (bytes already saved on HBM side)
        return jnp.bfloat16
    return jnp.float32


def _pick_batch_tile(n, live_bytes_per_plane, budget, num_cores, sublane_aligned):
    """Planes per grid step.

    Prefer (a) a step count that shards evenly across TensorCores when there
    are 2 of them, (b) divisors of n, (c) the largest tile that fits `budget`
    (which already accounts for kernel-body temporaries).  When the batch dim
    is the sublane dim (flattened layout), the tile must be a multiple of 8 or
    the whole batch.
    """
    cap = int(max(1, min(n, budget // max(1, live_bytes_per_plane))))

    def legal(t):
        return (not sublane_aligned) or (t % 8 == 0) or (t == n)

    best, best_key = None, None
    for t in range(1, cap + 1):
        if not legal(t):
            continue
        steps = -(-n // t)
        balanced = (num_cores <= 1) or (steps % num_cores == 0) or (steps >= 4 * num_cores)
        key = (balanced, n % t == 0, t)
        if best_key is None or key > best_key:
            best, best_key = t, key
    if best is None:
        # Tiny/awkward batch that cannot be sublane-aligned within budget.
        best = n if (not sublane_aligned or n <= 8) else 8
    return best


# ----------------------------------------------------------------------------
# Wrapper
# ----------------------------------------------------------------------------
def sobelxy(x: jax.Array) -> jax.Array:
    """x: (N, 1, H, W) -> (N, 1, H, W);  |sobel_x(x)| + |sobel_y(x)|, zero pad=1."""
    N, C, H, W = x.shape
    assert C == 1, "Sobelxy expects single-channel NCHW input (like the PyTorch module)."
    HW = H * W

    cdt = _compute_dtype(x.dtype)
    in_b = x.dtype.itemsize
    c_b = np.dtype(cdt).itemsize
    ncores = _num_tensorcores()
    vmem_cap = _vmem_capacity_bytes()

    use_3d = (W % 128 == 0) and (H >= 8)

    # Live bytes per plane per grid step: double-buffered input + output blocks
    # plus ~8 block-sized compute temporaries (roll results are materialized).
    live_per_plane = HW * (4 * in_b + 8 * c_b)
    mask_bytes = (2 * H + 2 * W) * c_b if use_3d else 4 * HW * c_b

    step_budget = max(live_per_plane, min(24 << 20, vmem_cap // 3) - mask_bytes)
    tb = _pick_batch_tile(N, live_per_plane, step_budget, ncores,
                          sublane_aligned=not use_3d)
    grid = (pl.cdiv(N, tb),)

    need = mask_bytes + tb * live_per_plane + (2 << 20)
    vmem_limit = int(min(max(need, 16 << 20), max(24 << 20, vmem_cap - (16 << 20))))

    cparams = pltpu.CompilerParams(
        dimension_semantics=("parallel",),
        vmem_limit_bytes=vmem_limit,
    )

    if use_3d:
        x3 = x.reshape(N, H, W)
        ih = jnp.arange(H, dtype=jnp.int32)
        iw = jnp.arange(W, dtype=jnp.int32)
        row_m = jnp.stack([ih >= 1, ih <= H - 2]).astype(cdt).reshape(2, H, 1)
        col_m = jnp.stack([iw >= 1, iw <= W - 2]).astype(cdt).reshape(2, 1, W)

        kern = functools.partial(_sobel_3d_kernel, H=H, W=W, compute_dtype=cdt)
        out = pl.pallas_call(
            kern,
            out_shape=jax.ShapeDtypeStruct((N, H, W), x.dtype),
            grid_spec=pltpu.PrefetchScalarGridSpec(
                num_scalar_prefetch=0,
                grid=grid,
                in_specs=[
                    pl.BlockSpec((2, H, 1), lambda b: (0, 0, 0)),   # resident row masks
                    pl.BlockSpec((2, 1, W), lambda b: (0, 0, 0)),   # resident col masks
                    pl.BlockSpec((tb, H, W), lambda b: (b, 0, 0)),
                ],
                out_specs=pl.BlockSpec((tb, H, W), lambda b: (b, 0, 0)),
            ),
            compiler_params=cparams,
        )(row_m, col_m, x3)
        return out.reshape(N, 1, H, W)

    # Flattened (lane-packed) path.
    x2 = x.reshape(N, HW)   # free row-major reshape; no padding pass, lane-dense.
    f = jnp.arange(HW, dtype=jnp.int32)
    j = f % W
    masks = jnp.stack([
        f >= W,         # not_top   (row i-1 exists)
        f < HW - W,     # not_bot   (row i+1 exists)
        j >= 1,         # not_left  (col j-1 exists)
        j <= W - 2,     # not_right (col j+1 exists)
    ]).astype(cdt)      # (4, HW), computed once outside the kernel

    kern = functools.partial(_sobel_flat_kernel, W=W, HW=HW, compute_dtype=cdt)
    out = pl.pallas_call(
        kern,
        out_shape=jax.ShapeDtypeStruct((N, HW), x.dtype),
        grid_spec=pltpu.PrefetchScalarGridSpec(
            num_scalar_prefetch=0,
            grid=grid,
            in_specs=[
                pl.BlockSpec((4, HW), lambda b: (0, 0)),            # resident masks
                pl.BlockSpec((tb, HW), lambda b: (b, 0)),
            ],
            out_specs=pl.BlockSpec((tb, HW), lambda b: (b, 0)),
        ),
        compiler_params=cparams,
    )(masks, x2)
    return out.reshape(N, 1, H, W)


# ----------------------------------------------------------------------------
# Pure-JAX reference (lax.conv) for the correctness check
# ----------------------------------------------------------------------------
def _sobelxy_ref(x: jax.Array) -> jax.Array:
    kx = jnp.array(_KX, jnp.float32).reshape(1, 1, 3, 3)
    ky = jnp.array(_KY, jnp.float32).reshape(1, 1, 3, 3)
    dn = jax.lax.conv_dimension_numbers(x.shape, kx.shape, ("NCHW", "OIHW", "NCHW"))
    sx = jax.lax.conv_general_dilated(x, kx, (1, 1), ((1, 1), (1, 1)),
                                      dimension_numbers=dn)
    sy = jax.lax.conv_general_dilated(x, ky, (1, 1), ((1, 1), (1, 1)),
                                      dimension_numbers=dn)
    return jnp.abs(sx) + jnp.abs(sy)


if __name__ == "__main__":
    key = jax.random.PRNGKey(0)
    k1, k2 = jax.random.split(key)

    # 1) Flattened (lane-packed) path: W not a multiple of 128.
    x1 = jax.random.normal(k1, (2, 1, 16, 16), dtype=jnp.float32)
    out1 = jax.block_until_ready(sobelxy(x1))
    ref1 = _sobelxy_ref(x1)
    assert out1.shape == (2, 1, 16, 16)
    assert jnp.allclose(out1, ref1, atol=1e-5, rtol=1e-5), "flat path mismatch vs reference"

    # 2) 3-D (sublane=H, lane=W) path: W % 128 == 0.
    x2 = jax.random.normal(k2, (2, 1, 8, 128), dtype=jnp.float32)
    out2 = jax.block_until_ready(sobelxy(x2))
    ref2 = _sobelxy_ref(x2)
    assert out2.shape == (2, 1, 8, 128)
    assert jnp.allclose(out2, ref2, atol=1e-5, rtol=1e-5), "3-D path mismatch vs reference"

    print("KERNEL_OK")
</pallas_src>

<mosaic_0001>
module attributes {stable_mosaic.version = 11 : i64} {
  func.func @_sobel_flat_kernel(%arg0: i32, %arg1: memref<4x256xf32, #tpu.memory_space<vmem>>, %arg2: memref<2x256xf32, #tpu.memory_space<vmem>>, %arg3: memref<2x256xf32, #tpu.memory_space<vmem>>) attributes {dimension_semantics = [#tpu.dimension_semantics<parallel>], iteration_bounds = array<i64: 1>, scalar_prefetch = 0 : i64, scratch_operands = 0 : i64, tpu.core_type = #tpu.core_type<tc>, window_params = [{pipeline_mode = #tpu.pipeline_mode<synchronous>, transform_indices = @transform_0, window_bounds = array<i64: 4, 256>}, {transform_indices = @transform_1, window_bounds = array<i64: 2, 256>}, {transform_indices = @transform_2, window_bounds = array<i64: 2, 256>}]} {
    %c0 = arith.constant 0 : index
    %c0_0 = arith.constant 0 : index
    %0 = vector.load %arg2[%c0, %c0_0] : memref<2x256xf32, #tpu.memory_space<vmem>>, vector<2x256xf32>
    %c0_1 = arith.constant 0 : index
    %c0_2 = arith.constant 0 : index
    %1 = vector.load %arg1[%c0_1, %c0_2] : memref<4x256xf32, #tpu.memory_space<vmem>>, vector<1x256xf32>
    %c1 = arith.constant 1 : index
    %c0_3 = arith.constant 0 : index
    %2 = vector.load %arg1[%c1, %c0_3] : memref<4x256xf32, #tpu.memory_space<vmem>>, vector<1x256xf32>
    %c2 = arith.constant 2 : index
    %c0_4 = arith.constant 0 : index
    %3 = vector.load %arg1[%c2, %c0_4] : memref<4x256xf32, #tpu.memory_space<vmem>>, vector<1x256xf32>
    %c3 = arith.constant 3 : index
    %c0_5 = arith.constant 0 : index
    %4 = vector.load %arg1[%c3, %c0_5] : memref<4x256xf32, #tpu.memory_space<vmem>>, vector<1x256xf32>
    %c16_i32 = arith.constant 16 : i32
    %5 = tpu.dynamic_rotate %0 by %c16_i32 dim 1 : vector<2x256xf32>, i32 -> vector<2x256xf32>
    %6 = vector.broadcast %1 : vector<1x256xf32> to vector<2x256xf32>
    %7 = arith.mulf %5, %6 : vector<2x256xf32>
    %c240_i32 = arith.constant 240 : i32
    %8 = tpu.dynamic_rotate %0 by %c240_i32 dim 1 : vector<2x256xf32>, i32 -> vector<2x256xf32>
    %9 = vector.broadcast %2 : vector<1x256xf32> to vector<2x256xf32>
    %10 = arith.mulf %8, %9 : vector<2x256xf32>
    %cst = arith.constant 2.000000e+00 : f32
    %11 = vector.broadcast %cst : f32 to vector<2x256xf32>
    %12 = arith.mulf %11, %0 : vector<2x256xf32>
    %13 = arith.addf %7, %12 : vector<2x256xf32>
    %14 = arith.addf %13, %10 : vector<2x256xf32>
    %15 = arith.subf %7, %10 : vector<2x256xf32>
    %c255_i32 = arith.constant 255 : i32
    %16 = tpu.dynamic_rotate %14 by %c255_i32 dim 1 : vector<2x256xf32>, i32 -> vector<2x256xf32>
    %17 = vector.broadcast %4 : vector<1x256xf32> to vector<2x256xf32>
    %18 = arith.mulf %16, %17 : vector<2x256xf32>
    %c1_i32 = arith.constant 1 : i32
    %19 = tpu.dynamic_rotate %14 by %c1_i32 dim 1 : vector<2x256xf32>, i32 -> vector<2x256xf32>
    %20 = vector.broadcast %3 : vector<1x256xf32> to vector<2x256xf32>
    %21 = arith.mulf %19, %20 : vector<2x256xf32>
    %c255_i32_6 = arith.constant 255 : i32
    %22 = tpu.dynamic_rotate %15 by %c255_i32_6 dim 1 : vector<2x256xf32>, i32 -> vector<2x256xf32>
    %23 = vector.broadcast %4 : vector<1x256xf32> to vector<2x256xf32>
    %24 = arith.mulf %22, %23 : vector<2x256xf32>
    %c1_i32_7 = arith.constant 1 : i32
    %25 = tpu.dynamic_rotate %15 by %c1_i32_7 dim 1 : vector<2x256xf32>, i32 -> vector<2x256xf32>
    %26 = vector.broadcast %3 : vector<1x256xf32> to vector<2x256xf32>
    %27 = arith.mulf %25, %26 : vector<2x256xf32>
    %28 = arith.subf %18, %21 : vector<2x256xf32>
    %cst_8 = arith.constant 2.000000e+00 : f32
    %29 = vector.broadcast %cst_8 : f32 to vector<2x256xf32>
    %30 = arith.mulf %29, %15 : vector<2x256xf32>
    %31 = arith.addf %27, %30 : vector<2x256xf32>
    %32 = arith.addf %31, %24 : vector<2x256xf32>
    %33 = math.absf %28 : vector<2x256xf32>
    %34 = math.absf %32 : vector<2x256xf32>
    %35 = arith.addf %33, %34 : vector<2x256xf32>
    %c0_9 = arith.constant 0 : index
    %c0_10 = arith.constant 0 : index
    %36 = vector.load %arg3[%c0_9, %c0_10] : memref<2x256xf32, #tpu.memory_space<vmem>>, vector<2x256xf32>
    tpu.vector_store %arg3[%c0_9, %c0_10], %35 {strides = array<i32>} : memref<2x256xf32, #tpu.memory_space<vmem>>, vector<2x256xf32>,
    return
  }
  func.func @transform_0(%arg0: i32) -> (i32, i32) {
    %c0_i32 = arith.constant 0 : i32
    %c0_i32_0 = arith.constant 0 : i32
    %c0_i32_1 = arith.constant 0 : i32
    return %c0_i32, %c0_i32_0 : i32, i32
  }
  func.func @transform_1(%arg0: i32) -> (i32, i32) {
    %c0_i32 = arith.constant 0 : i32
    %c0_i32_0 = arith.constant 0 : i32
    return %arg0, %c0_i32 : i32, i32
  }
  func.func @transform_2(%arg0: i32) -> (i32, i32) {
    %c0_i32 = arith.constant 0 : i32
    %c0_i32_0 = arith.constant 0 : i32
    return %arg0, %c0_i32 : i32, i32
  }
}

</mosaic_0001>

<bundles_post_ra>
// kernel: tpu_custom_call.1
= control target key start
LH: loop header
LB: loop body
LE: loop exit
PB: predicated region body
PF: predicated region fallthrough
CT: control target
= control target key end

     0   :  { %7 = vsyncpa [#allocation3], 0  ;;  %s375_s0 = inlined_call_operand.hbm [shape: f32[4,256], index: 0, kind: input, shape index: {}]   ;;  %s376_s1 = inlined_call_operand.hbm [shape: f32[2,256], index: 1, kind: input, shape index: {}]   ;;  %s377_s2 = inlined_call_operand.hbm [shape: f32[2,256], index: 2, kind: output, shape index: {}]  }
   0x1   :  { %8 = vsyncpa [#allocation6], 0 }
   0x2   :  { %9 = vsyncpa [#allocation4], 0  ;;  %s294_s9 = smov [#allocation2]   ;;  %s295_s11 = smov [#allocation5]  }
   0x3   :  { %s16_s10 = sshll.u32 %s294_s9, 4  ;;  %s26_s12 = sshll.u32 %s295_s11, 4  ;;  %s17_s10 = int_to_ptr.vmem [resolvable:$true] %s16_s10  ;;  %s27_s12 = int_to_ptr.vmem [resolvable:$true] %s26_s12 }
   0x4   :  { %s222_s15 = scalar_lea.hbm %s375_s0, 128 }
   0x5   :  { %p223_p0 = scmp.ne.s32.totalorder %s375_s0, %s222_s15  ;;  %p226_p1 = scmp.lt.u32.totalorder %s222_s15, %s375_s0 }
   0x7   :  { %p228_p2 = pnand %p226_p1, %p223_p0 }
   0x9   :  { %231 = shalt.err (!%p228_p2)
}
   0xa   :  { %s232_s20 = scalar_lea.vmem %s17_s10, 128  ;;  %p237_p4 = scmp.lt.s32.totalorder %s17_s10, %s17_s10 }
   0xb   :  { %p233_p3 = scmp.ne.s32.totalorder %s17_s10, %s232_s20  ;;  %p238_p5 = scmp.lt.s32.totalorder %s232_s20, %s232_s20 }
   0xd   :  { %p239_p6 = por %p238_p5, %p237_p4 }
   0xf   :  { %p240_p7 = pnand %p239_p6, %p233_p3 }
  0x11   :  { %243 = shalt.err (!%p240_p7)
}
  0x12   :  { %19 = dma.hbm_to_vmem [thread:$0]  %s375_s0, 128, %s17_s10, [#allocation3]  }
  0x13   :  { %s244_s25 = scalar_lea.hbm %s376_s1, 64 }
  0x14   :  { %p245_p8 = scmp.ne.s32.totalorder %s376_s1, %s244_s25  ;;  %p248_p9 = scmp.lt.u32.totalorder %s244_s25, %s376_s1 }
  0x16   :  { %p250_p10 = pnand %p248_p9, %p245_p8 }
  0x18   :  { %253 = shalt.err (!%p250_p10)
}
  0x19   :  { %s254_s30 = scalar_lea.vmem %s27_s12, 64  ;;  %p259_p12 = scmp.lt.s32.totalorder %s27_s12, %s27_s12 }
  0x1a   :  { %p255_p11 = scmp.ne.s32.totalorder %s27_s12, %s254_s30  ;;  %p260_p13 = scmp.lt.s32.totalorder %s254_s30, %s254_s30 }
  0x1c   :  { %p261_p0 = por %p260_p13, %p259_p12 }
  0x1e   :  { %p262_p1 = pnand %p261_p0, %p255_p11 }
  0x20   :  { %265 = shalt.err (!%p262_p1)
}
  0x21   :  { %29 = dma.hbm_to_vmem [thread:$0]  %s376_s1, 64, %s27_s12, [#allocation6]  }
  0x22   :  { %288 = dma.done.wait [#allocation3], 128  }
  0x23   :  { %289 = vsyncadd [#allocation3], 4294967168 }
  0x24   :  { %290 = dma.done.wait [#allocation6], 64  }
  0x25   :  { %291 = vsyncadd [#allocation6], 4294967232  ;;  %v48_v0 = vlaneseq  ;;  %v296_v1 = vmov 1983009808   ;;  %v36_v6 = vld [vmem:[#allocation5] sm:$0xf] }
  0x26   :  { %v46_v2 = vunpack.c.l.s4 %v296_v1  ;;  %v97_v8 = vmul.f32 2.0, %v36_v6  ;;  %s297_s4 = smov 112   ;;  %s298_s5 = smov 16   ;;  %v39_v14 = vld [vmem:[#allocation2 + $0x1] ss:$4 sm:$0x3] }
  0x27   :  { %v49_v3 = vshrl.u32 %v48_v0, 7  ;;  %v341_v11 = vand.u32 127, %v48_v0  ;;  %v37_v15 = vld [vmem:[#allocation2] ss:$4 sm:$0x3]  ;;  %s299_s1 = smov 1  }
  0x28   :  { %v47_v4 = vunpack.c.0.s8 %v46_v2  ;;  %s300_s6 = smov 127   ;;  %v41_v41 = vld [vmem:[#allocation2 + $0x2] ss:$4 sm:$0x3]  ;;  %s301_s7 = smov [#allocation7]  }
  0x29   :  { %v67_v12 = vsub.s32 0, %v49_v3  ;;  %v71_v13 = vsub.s32 1, %v49_v3  ;;  %vm81_vm0 = vcmp.lt.s32.totalorder %v341_v11, 112  ;;  %vm61_vm1 = vcmp.lt.s32.totalorder %v341_v11, 16  ;;  %s203_s8 = sshll.u32 %s301_s7, 4  ;;  %s204_s8 = int_to_ptr.vmem [resolvable:$true] %s203_s8 }
  0x2a   :  { %v50_v5 = vsub.s32 %v47_v4, %v49_v3  ;;  %vm139_vm2 = vcmp.lt.s32.totalorder %v341_v11, 1  ;;  %v43_v43 = vld [vmem:[#allocation2 + $0x3] ss:$4 sm:$0x3]  ;;  %vm119_vm3 = vcmp.lt.s32.totalorder %v341_v11, 127  ;;  %s266_s9 = scalar_lea.vmem %s204_s8, 64  ;;  %p271_p3 = scmp.lt.s32.totalorder %s204_s8, %s204_s8 }
  0x2b   :  { %v88_v18 = vrot.slane %v39_v14, %v67_v12  ;;  %v92_v19 = vrot.slane %v39_v14, %v71_v13  ;;  %v68_v20 = vrot.slane %v37_v15, %v67_v12  ;;  %v72_v21 = vrot.slane %v37_v15, %v71_v13  ;;  %p267_p2 = scmp.ne.s32.totalorder %s204_s8, %s266_s9  ;;  %p272_p4 = scmp.lt.s32.totalorder %s266_s9, %s266_s9 }
  0x2c   :  { %v51_v7 = vrot.slane %v36_v6, %v50_v5  ;;  %v105_v10 = vrot.slane %v97_v8, %v50_v5  ;;  %v146_v45 = vrot.slane %v41_v41, %v67_v12  ;;  %v150_v46 = vrot.slane %v41_v41, %v71_v13 }
  0x2d   :  { %v126_v49 = vrot.slane %v43_v43, %v67_v12  ;;  %v130_v50 = vrot.slane %v43_v43, %v71_v13  ;;  %p273_p5 = por %p272_p4, %p271_p3 }
  0x2e   :  { %77 = vrot.lane.b32.xlu1 %v51_v7, %s297_s4  ;;  %55 = vrot.lane.b32.xlu0 %v51_v7, %s298_s5  ;;  %v52_v9 = vcombine.high %v51_v7, %v51_v7  ;;  %v106_v23 = vcombine.high %v105_v10, %v105_v10 }
  0x2f   :  { %p274_p6 = pnand %p273_p5, %p267_p2 }
  0x32   :  { %79 = vrot.lane.b32.xlu1 %v52_v9, %s297_s4  ;;  %57 = vrot.lane.b32.xlu0 %v52_v9, %s298_s5 }
  0xa0   :  { %v78_v16 = vpop.permute.xlu1 %77  ;;  %v56_v17 = vpop.permute.xlu0 %55 }
  0xa4   :  { %v80_v22 = vpop.permute.xlu1 %79  ;;  %v58_v24 = vpop.permute.xlu0 %57 }
  0xa5   :  { %v82_v25 = vsel %vm81_vm0, %v78_v16, %v80_v22  ;;  %v83_v26 = vsel %vm81_vm0, %v80_v22, %v78_v16  ;;  %v62_v27 = vsel %vm61_vm1, %v56_v17, %v58_v24  ;;  %v63_v28 = vsel %vm61_vm1, %v58_v24, %v56_v17 }
  0xa6   :  { %v95_v29 = vmul.f32 %v88_v18, %v82_v25  ;;  %v96_v30 = vmul.f32 %v92_v19, %v83_v26  ;;  %v75_v31 = vmul.f32 %v68_v20, %v63_v28  ;;  %v76_v32 = vmul.f32 %v72_v21, %v62_v27 }
  0xa8   :  { %v109_v33 = vadd.f32 %v105_v10, %v75_v31  ;;  %v110_v34 = vadd.f32 %v106_v23, %v76_v32  ;;  %v113_v35 = vsub.f32 %v75_v31, %v95_v29  ;;  %v114_v36 = vsub.f32 %v76_v32, %v96_v30 }
  0xaa   :  { %163 = vrot.lane.b32.xlu0 %v113_v35, %s299_s1  ;;  %165 = vrot.lane.b32.xlu1 %v114_v36, %s299_s1  ;;  %v111_v37 = vadd.f32 %v109_v33, %v95_v29  ;;  %v112_v38 = vadd.f32 %v110_v34, %v96_v30  ;;  %v173_v61 = vmul.f32 2.0, %v113_v35  ;;  %v174_v63 = vmul.f32 2.0, %v114_v36 }
  0xae   :  { %115 = vrot.lane.b32.xlu0 %v111_v37, %s300_s6  ;;  %117 = vrot.lane.b32.xlu1 %v112_v38, %s300_s6 }
  0xb2   :  { %135 = vrot.lane.b32.xlu0 %v111_v37, %s299_s1  ;;  %137 = vrot.lane.b32.xlu1 %v112_v38, %s299_s1 }
  0xb6   :  { %155 = vrot.lane.b32.xlu0 %v113_v35, %s300_s6  ;;  %157 = vrot.lane.b32.xlu1 %v114_v36, %s300_s6 }
 0x11c   :  { %v164_v39 = vpop.permute.xlu0 %163  ;;  %v166_v40 = vpop.permute.xlu1 %165 }
 0x11d   :  { %v168_v47 = vsel %vm139_vm2, %v166_v40, %v164_v39  ;;  %v167_v48 = vsel %vm139_vm2, %v164_v39, %v166_v40 }
 0x11e   :  { %v169_v54 = vmul.f32 %v168_v47, %v146_v45  ;;  %v170_v58 = vmul.f32 %v167_v48, %v150_v46 }
 0x120   :  { %v116_v42 = vpop.permute.xlu0 %115  ;;  %v118_v44 = vpop.permute.xlu1 %117  ;;  %v175_v3 = vadd.f32 %v173_v61, %v169_v54  ;;  %v176_v7 = vadd.f32 %v174_v63, %v170_v58 }
 0x121   :  { %v120_v51 = vsel %vm119_vm3, %v116_v42, %v118_v44  ;;  %v121_v55 = vsel %vm119_vm3, %v118_v44, %v116_v42 }
 0x122   :  { %v133_v62 = vmul.f32 %v126_v49, %v120_v51  ;;  %v134_v0 = vmul.f32 %v130_v50, %v121_v55 }
 0x124   :  { %v136_v52 = vpop.permute.xlu0 %135  ;;  %v138_v53 = vpop.permute.xlu1 %137 }
 0x125   :  { %v140_v56 = vsel %vm139_vm2, %v136_v52, %v138_v53  ;;  %v141_v57 = vsel %vm139_vm2, %v138_v53, %v136_v52 }
 0x126   :  { %v153_v59 = vmul.f32 %v146_v45, %v141_v57  ;;  %v154_v60 = vmul.f32 %v150_v46, %v140_v56 }
 0x128   :  { %v156_v1 = vpop.permute.xlu0 %155  ;;  %v158_v2 = vpop.permute.xlu1 %157  ;;  %v171_v4 = vsub.f32 %v133_v62, %v153_v59  ;;  %v172_v8 = vsub.f32 %v134_v0, %v154_v60 }
 0x129   :  { %v159_v5 = vsel %vm119_vm3, %v156_v1, %v158_v2  ;;  %v160_v6 = vsel %vm119_vm3, %v158_v2, %v156_v1 }
 0x12a   :  { %v161_v9 = vmul.f32 %v159_v5, %v126_v49  ;;  %v162_v10 = vmul.f32 %v160_v6, %v130_v50  ;;  %v179_v14 = vand.u32 2147483647, %v171_v4  ;;  %v180_v15 = vand.u32 2147483647, %v172_v8 }
 0x12c   :  { %v177_v12 = vadd.f32 %v175_v3, %v161_v9  ;;  %v178_v13 = vadd.f32 %v176_v7, %v162_v10 }
 0x12e   :  { %v181_v16 = vand.u32 2147483647, %v177_v12  ;;  %v182_v17 = vand.u32 2147483647, %v178_v13 }
 0x130   :  { %v183_v18 = vadd.f32 %v181_v16, %v179_v14  ;;  %v184_v19 = vadd.f32 %v182_v17, %v180_v15 }
 0x132   :  { %v187_v20 = vcombine.low %v183_v18, %v184_v19 }
 0x134   :  { %213 = vst.sshfl [vmem:[#allocation7] sm:$0x33 pattern:$0x76325410] %v187_v20 }
 0x135   :  { %277 = shalt.err (!%p274_p6)
}
 0x136   :  { %s278_s12 = scalar_lea.hbm %s377_s2, 64 }
 0x137   :  { %p279_p7 = scmp.ne.s32.totalorder %s377_s2, %s278_s12  ;;  %p282_p8 = scmp.lt.u32.totalorder %s278_s12, %s377_s2 }
 0x139   :  { %p284_p9 = pnand %p282_p8, %p279_p7 }
 0x13b   :  { %287 = shalt.err (!%p284_p9)
}
 0x13c   :  { %206 = dma.vmem_to_hbm [thread:$0]  %s204_s8, 64, %s377_s2, [#allocation4]  }
 0x13d   :  { %292 = dma.done.wait [#allocation4], 64  }
 0x13e   :  { %293 = vsyncadd [#allocation4], 4294967232 }
 0x13f   :  { %210 = vsyncpa [#allocation3], 1 }
 0x140   :  { %211 = vsyncpa [#allocation6], 1 }
 0x141   :  { %212 = vsyncpa [#allocation4], 1 }

</bundles_post_ra>
